<compile_context>
chip_gen: v5e
topology: v5e:2x2
jax: 0.10.0
libtpu: 0.0.40
codegen_flags: <defaults>
</compile_context>

<pallas_src>
import math
import functools

import jax
import jax.numpy as jnp
from jax import lax
from jax.experimental import pallas as pl
from jax.experimental.pallas import tpu as pltpu


def _round_up(x, n):
    return ((x + n - 1) // n) * n


def _cosface_kernel(xn_ref, w_ref, label_ref, out_ref, *, s, m, tile_c):
    j = pl.program_id(1)                       # class-tile index (innermost axis)

    xn = xn_ref[...]                           # (tile_b, D)  compute dtype
    w = w_ref[...]                             # (tile_c, D)  compute dtype (raw)

    # Raw weight tile straight to the MXU, contracting the last dims (x @ W^T),
    # f32 accumulation.  No pre-scaling of the (tile_c, D) tile.
    cos_un = lax.dot_general(
        xn, w,
        dimension_numbers=(((1,), (1,)), ((), ())),
        preferred_element_type=jnp.float32,
    )                                          # (tile_b, tile_c)

    # Per-class squared norms as a (1, tile_c) row via a tiny ones-row matmul:
    # lands lane-major directly (no cross-lane relayout), f32 accumulation.
    # Squares are done in f32 for norm accuracy (weights may be bf16-rounded).
    w32 = w.astype(jnp.float32)
    ones_row = jnp.ones((1, w32.shape[1]), jnp.float32)
    wsq = lax.dot_general(
        ones_row, w32 * w32,
        dimension_numbers=(((1,), (1,)), ((), ())),
        preferred_element_type=jnp.float32,
    )                                          # (1, tile_c)
    inv_wn = lax.rsqrt(jnp.maximum(wsq, 1e-24))

    # Post-matmul normalization: scale the (tile_b, tile_c) cosine instead of
    # the (tile_c, D) weight tile.
    cosine = cos_un * inv_wn

    # CosFace additive margin on the target class only, fused where-select.
    tb, tc = cosine.shape
    class_ids = j * tile_c + lax.broadcasted_iota(jnp.int32, (tb, tc), 1)
    is_target = class_ids == label_ref[...]    # (tile_b, 1) broadcasts
    out_ref[...] = (jnp.where(is_target, cosine - m, cosine) * s).astype(out_ref.dtype)


def cosface_forward(x, weight, label, *, s=64.0, m=0.35,
                    tile_b=256, tile_c=512, compute_dtype=jnp.bfloat16):
    """CosFace forward.

    x:      (B, D) float        weight: (C, D) float (fed untransposed, unpadded)
    label:  (B,)   int          returns (B, C) float32 logits
    compute_dtype: dtype of the MXU operands (default bf16); accumulation and
                   the margin epilogue are always f32.
    """
    B, D = x.shape
    C, D2 = weight.shape
    assert D == D2

    # --- tile selection -----------------------------------------------------
    # tile_c is always a multiple of 128 (lane-dense unmasked stores); keep it
    # a multiple of 256 by default (512) to fill the 256-wide v6e/v7x MXU.
    tile_c = max(128, _round_up(int(tile_c), 128))
    tile_c = min(tile_c, _round_up(C, 128))
    if C > 128 and pl.cdiv(C, tile_c) < 2:
        # v7x megacore: prefer >= 2 class tiles so both TensorCores get work.
        tile_c = max(128, _round_up(pl.cdiv(C, 2), 128))
    num_c = pl.cdiv(C, tile_c)

    # Batch tiling bounds VMEM independent of B (v7x has only 64 MiB per TC)
    # while keeping the MXU M dimension large; W is re-streamed num_b times.
    tile_b = max(8, _round_up(min(int(tile_b), _round_up(B, 8)), 8))
    num_b = pl.cdiv(B, tile_b)

    # --- operand prep (no pad/transpose passes over W) -----------------------
    # F.normalize(x) hoisted to the wrapper: done once, O(B*D).
    x32 = x.astype(jnp.float32)
    inv_xn = lax.rsqrt(jnp.maximum(jnp.sum(x32 * x32, axis=-1, keepdims=True), 1e-24))
    xn = (x32 * inv_xn).astype(compute_dtype)

    # In real training, store the weight persistently in compute_dtype to make
    # this a no-op; the kernel reads it as-is, (C, D), no transpose, no pad.
    w = weight if weight.dtype == compute_dtype else weight.astype(compute_dtype)

    label2d = label.reshape(B, 1).astype(jnp.int32)

    kernel = functools.partial(_cosface_kernel, s=float(s), m=float(m), tile_c=tile_c)

    # --- VMEM sizing: actual double-buffered tiles, clamped below capacity ---
    isz = jnp.dtype(compute_dtype).itemsize
    vmem_need = (2 * tile_c * D * isz          # W tile (dominant stream), 2 bufs
                 + 2 * tile_b * D * isz        # normalized-x tile, 2 bufs
                 + 2 * tile_b * tile_c * 4     # f32 output tile, 2 bufs
                 + 2 * tile_b * 128 * 4)       # label block (lane-padded)
    try:
        vmem_cap = int(pltpu.get_tpu_info().vmem_capacity_bytes)
    except Exception:
        vmem_cap = 64 << 20                    # assume the smallest (v7x per-TC)
    vmem_limit = int(min(max(vmem_need + (2 << 20), 16 << 20),
                         vmem_cap - (16 << 20)))

    cost = pl.CostEstimate(
        flops=2 * B * C * D + 2 * num_b * C * D,   # main matmul + norm matmuls
        transcendentals=num_b * C,                 # per-class rsqrt per batch tile
        bytes_accessed=(B * D * isz + num_b * C * D * isz + B * C * 4 + B * 4),
    )

    out = pl.pallas_call(
        kernel,
        out_shape=jax.ShapeDtypeStruct((B, C), jnp.float32),   # exact shape: no unpad slice
        grid=(num_b, num_c),                                   # class axis innermost
        in_specs=[
            pl.BlockSpec((tile_b, D), lambda i, j: (i, 0)),    # x_n batch tile
            pl.BlockSpec((tile_c, D), lambda i, j: (j, 0)),    # raw (C, D) class tile
            pl.BlockSpec((tile_b, 1), lambda i, j: (i, 0)),    # labels batch tile
        ],
        out_specs=pl.BlockSpec((tile_b, tile_c), lambda i, j: (i, j)),
        compiler_params=pltpu.CompilerParams(
            dimension_semantics=("parallel", "parallel"),
            vmem_limit_bytes=vmem_limit),
        cost_estimate=cost,
    )(xn, w, label2d)

    return out


def _reference(x, weight, label, *, s=64.0, m=0.35):
    eps = 1e-12
    x_n = x / jnp.maximum(jnp.linalg.norm(x, axis=-1, keepdims=True), eps)
    w_n = weight / jnp.maximum(jnp.linalg.norm(weight, axis=-1, keepdims=True), eps)
    cosine = x_n @ w_n.T
    phi = cosine - m
    one_hot = jax.nn.one_hot(label, weight.shape[0], dtype=jnp.float32)
    return (one_hot * phi + (1.0 - one_hot) * cosine) * s


if __name__ == "__main__":
    # Small shapes: batch=8, in_features=32, out_features (classes)=200.
    # D=32 exercises a non-128 feature dim (full-extent block), C=200 exercises
    # a 2-step class grid (128-wide tiles) with a ragged, masked last tile.
    B, D, C = 8, 32, 200
    key = jax.random.PRNGKey(0)
    kx, kw, kl = jax.random.split(key, 3)

    x = jax.random.normal(kx, (B, D), dtype=jnp.float32)

    # Deterministic xavier_uniform_-style init for weight (C, D).
    bound = math.sqrt(6.0 / (D + C))
    weight = jax.random.uniform(kw, (C, D), minval=-bound, maxval=bound,
                                dtype=jnp.float32)

    label = jax.random.randint(kl, (B,), 0, C, dtype=jnp.int32)

    ref = _reference(x, weight, label)

    # Default path: bf16 MXU operands, f32 accumulation/epilogue.
    # cosine error ~few*2^-9, scaled by s=64 -> loose absolute tolerance.
    out = jax.block_until_ready(cosface_forward(x, weight, label))
    assert out.shape == (B, C)
    assert jnp.allclose(out, ref, atol=0.5, rtol=1e-2), "bf16 mismatch vs reference"

    # Accuracy-debug path: f32 operands, tight tolerance vs the exact reference.
    out32 = jax.block_until_ready(
        cosface_forward(x, weight, label, compute_dtype=jnp.float32))
    assert out32.shape == (B, C)
    assert jnp.allclose(out32, ref, atol=2e-3, rtol=2e-3), "f32 mismatch vs reference"

    # TODO(synk): the PyTorch device_id!=None model-parallel path (torch.chunk of W
    # across GPUs + concat) has no single-device Pallas equivalent; the class-tiled
    # grid here covers the single-device semantics.

    print("KERNEL_OK")
</pallas_src>

<mosaic_0001>
module attributes {stable_mosaic.version = 11 : i64} {
  func.func @_cosface_kernel(%arg0: i32, %arg1: i32, %arg2: memref<8x32xbf16, #tpu.memory_space<vmem>>, %arg3: memref<128x32xbf16, #tpu.memory_space<vmem>>, %arg4: memref<8x1xi32, #tpu.memory_space<vmem>>, %arg5: memref<8x128xf32, #tpu.memory_space<vmem>>) attributes {dimension_semantics = [#tpu.dimension_semantics<parallel>, #tpu.dimension_semantics<parallel>], iteration_bounds = array<i64: 1, 2>, scalar_prefetch = 0 : i64, scratch_operands = 0 : i64, tpu.core_type = #tpu.core_type<tc>, window_params = [{transform_indices = @transform_0, window_bounds = array<i64: 8, 32>}, {transform_indices = @transform_1, window_bounds = array<i64: 128, 32>}, {transform_indices = @transform_2, window_bounds = array<i64: 8, 1>}, {transform_indices = @transform_3, window_bounds = array<i64: 8, 128>}]} {
    %c0 = arith.constant 0 : index
    %c0_0 = arith.constant 0 : index
    %0 = vector.load %arg2[%c0, %c0_0] : memref<8x32xbf16, #tpu.memory_space<vmem>>, vector<8x32xbf16>
    %c0_1 = arith.constant 0 : index
    %c0_2 = arith.constant 0 : index
    %1 = vector.load %arg3[%c0_1, %c0_2] : memref<128x32xbf16, #tpu.memory_space<vmem>>, vector<128x32xbf16>
    %cst = arith.constant dense<0.000000e+00> : vector<8x128xf32>
    %2 = tpu.matmul %0, %1, %cst {dimension_numbers = #tpu.dot_dimension_numbers<[1], [1], [0], [0], [0, 0, 1, 0], [], []>} : vector<8x32xbf16>, vector<128x32xbf16>, vector<8x128xf32> -> vector<8x128xf32>
    %3 = arith.extf %1 : vector<128x32xbf16> to vector<128x32xf32>
    %cst_3 = arith.constant 1.000000e+00 : f32
    %4 = vector.broadcast %cst_3 : f32 to vector<1x32xf32>
    %5 = arith.mulf %3, %3 : vector<128x32xf32>
    %cst_4 = arith.constant dense<0.000000e+00> : vector<1x128xf32>
    %6 = tpu.matmul %4, %5, %cst_4 {dimension_numbers = #tpu.dot_dimension_numbers<[1], [1], [0], [0], [0, 0, 1, 0], [], []>} : vector<1x32xf32>, vector<128x32xf32>, vector<1x128xf32> -> vector<1x128xf32>
    %cst_5 = arith.constant 1.000000e-24 : f32
    %7 = vector.broadcast %cst_5 : f32 to vector<1x128xf32>
    %8 = arith.maximumf %6, %7 : vector<1x128xf32>
    %9 = math.rsqrt %8 : vector<1x128xf32>
    %10 = vector.broadcast %9 : vector<1x128xf32> to vector<8x128xf32>
    %11 = arith.mulf %2, %10 : vector<8x128xf32>
    %c128_i32 = arith.constant 128 : i32
    %12 = arith.muli %arg1, %c128_i32 : i32
    %13 = tpu.iota {dimensions = array<i32: 1>} : vector<8x128xi32>
    %14 = vector.broadcast %12 : i32 to vector<8x128xi32>
    %15 = arith.addi %14, %13 : vector<8x128xi32>
    %c0_6 = arith.constant 0 : index
    %c0_7 = arith.constant 0 : index
    %16 = vector.load %arg4[%c0_6, %c0_7] : memref<8x1xi32, #tpu.memory_space<vmem>>, vector<8x1xi32>
    %17 = vector.broadcast %16 : vector<8x1xi32> to vector<8x128xi32>
    %18 = arith.cmpi eq, %15, %17 : vector<8x128xi32>
    %cst_8 = arith.constant 3.500000e-01 : f32
    %19 = vector.broadcast %cst_8 : f32 to vector<8x128xf32>
    %20 = arith.subf %11, %19 : vector<8x128xf32>
    %21 = arith.select %18, %20, %11 : vector<8x128xi1>, vector<8x128xf32>
    %cst_9 = arith.constant 6.400000e+01 : f32
    %22 = vector.broadcast %cst_9 : f32 to vector<8x128xf32>
    %23 = arith.mulf %21, %22 : vector<8x128xf32>
    %c0_10 = arith.constant 0 : index
    %c0_11 = arith.constant 0 : index
    %24 = vector.load %arg5[%c0_10, %c0_11] : memref<8x128xf32, #tpu.memory_space<vmem>>, vector<8x128xf32>
    tpu.vector_store %arg5[%c0_10, %c0_11], %23 {strides = array<i32>} : memref<8x128xf32, #tpu.memory_space<vmem>>, vector<8x128xf32>,
    return
  }
  func.func @transform_0(%arg0: i32, %arg1: i32) -> (i32, i32) {
    %c0_i32 = arith.constant 0 : i32
    %c0_i32_0 = arith.constant 0 : i32
    return %arg0, %c0_i32 : i32, i32
  }
  func.func @transform_1(%arg0: i32, %arg1: i32) -> (i32, i32) {
    %c0_i32 = arith.constant 0 : i32
    %c0_i32_0 = arith.constant 0 : i32
    return %arg1, %c0_i32 : i32, i32
  }
  func.func @transform_2(%arg0: i32, %arg1: i32) -> (i32, i32) {
    %c0_i32 = arith.constant 0 : i32
    %c0_i32_0 = arith.constant 0 : i32
    return %arg0, %c0_i32 : i32, i32
  }
  func.func @transform_3(%arg0: i32, %arg1: i32) -> (i32, i32) {
    %c0_i32 = arith.constant 0 : i32
    return %arg0, %arg1 : i32, i32
  }
}

</mosaic_0001>

<bundles_post_ra>
// kernel: tpu_custom_call.1
= control target key start
LH: loop header
LB: loop body
LE: loop exit
PB: predicated region body
PF: predicated region fallthrough
CT: control target
= control target key end

     0   :  { %8 = vsyncpa [#allocation3], 0  ;;  %s967_s0 = inlined_call_operand.vmem [shape: bf16[8,32], index: 0, kind: input, shape index: {}]   ;;  %s968_s1 = inlined_call_operand.vmem [shape: bf16[200,32], index: 1, kind: input, shape index: {}]   ;;  %s969_s2 = inlined_call_operand.vmem [shape: s32[8,1], index: 2, kind: input, shape index: {}]   ;;  %s970_s3 = inlined_call_operand.hbm [shape: f32[8,200], index: 3, kind: output, shape index: {}]  }
   0x1   :  { %10 = vsyncpa [#allocation3 + $0x1], 0  ;;  %s820_s12 = smov 0   ;;  %s822_s13 = smov 0  }
   0x2   :  { %s824_s14 = smov 0   ;;  %s826_s15 = smov 0  }
   0x3   :  { %s828_s16 = smov 0   ;;  %s830_s17 = smov 0  }
   0x4 LB: > { %s584_s18 = sadd.s32 4294967295, %s796_s17   ;;  %s585_s19 = sadd.s32 4294967294, %s796_s17   ;;  %s796_s17 = sphi %s830_s17, %s16_s17   ;;  %s792_s16 = sphi %s828_s16, %s977_s16   ;;  %s788_s15 = sphi %s826_s15, %s976_s15   ;;  %s784_s14 = sphi %s824_s14, %s975_s14   ;;  %s780_s13 = sphi %s822_s13, %s974_s13   ;;  %s776_s12 = sphi %s820_s12, %s973_s12  }
   0x5   : > { %s25_s20 = sadd.s32 1, %s792_s16  ;;  %s115_s21 = sadd.s32 1, %s784_s14 }
   0x6   : > { %p26_p0 = scmp.ge.s32.totalorder %s25_s20, 2  ;;  %p125_p1 = scmp.ne.s32.totalorder %s784_s14, %s780_s13 }
   0x7   : > { %p126_p2 = scmp.eq.s32.totalorder %s584_s18, 1  ;;  %p131_p3 = scmp.ne.s32.totalorder %s780_s13, %s776_s12 }
   0x8   : > { %s979_s20 = smov (%p26_p0, %s25_s20), 0  ;;  %p132_p5 = scmp.eq.s32.totalorder %s585_s19, 1 }
   0x9   : > { %p860_p4 = por %p126_p2, %p125_p1  ;;  %s111_s23 = ssub.s32 %s792_s16, %s979_s20 }
   0xa   : > { %p590_p6 = scmp.ge.s32.totalorder %s796_s17, 1  ;;  %p113_p7 = scmp.eq.s32.totalorder %s111_s23, 0 }
   0xb   : > { %p867_p8 = por %p132_p5, %p131_p3  ;;  %p181_p9 = scmp.lt.s32.totalorder %s796_s17, 3 }
   0xc   : > { %s873_s25 = scalar_select %p113_p7, %s784_s14, %s115_s21  }
   0xd   : > { %p182_p10 = pnand %p590_p6, %p181_p9 }
   0xe   : > { %s592_s26 = sshll.u32 (!%p182_p10), %s788_s15, 4  ;;  %s644_s8 = sshll.u32 (!%p182_p10), %s788_s15, 7 }
   0xf   : > { %185 = sbr.rel (%p182_p10) target bundleno = 249 (0xf9), region = 32  ;;  %p226_p11 = scmp.lt.s32.totalorder (!%p182_p10), %s592_s26, 24 }
  0x10   : > { %s214_s9 = sand.u32 (!%p182_p10), 1, %s780_s13   ;;  %s647_s11 = sshll.u32 (!%p182_p10), %s788_s15, 3 }
  0x11   : > { %s591_s10 = sshll.u32 (!%p182_p10), %s214_s9, 3  ;;  %s480_s21 = scalar_lea.hbm (!%p182_p10), %s970_s3, %s647_s11 }
  0x12   : > { %s216_s23 = scalar_lea.vmem (!%p182_p10), [#allocation2], %s591_s10  ;;  %s468_s15 = scalar_lea.sflag (!%p182_p10), [#allocation3], %s214_s9 }
  0x13   : > { %s738_s5 = scalar_lea.hbm (!%p182_p10), %s970_s3, 16 }
  0x14   : > { %s981_s26 = smov (!%p226_p11, %s592_s26), 24  ;;  %vm296_vm0 = vcmask 261120   ;;  %v458_v36 = vld [vmem:[%s969_s2] sm:$0xff]  ;;  %v798_v39 = vmov 0   ;;  %v799_v59 = vmov 1.0  }
  0x15   : > { %s593_s27 = sshll.u32 %s981_s26, 2  ;;  %715 = vset.pattern.permute.xlu0 %v798_v39  ;;  %v239_v58 = vld [vmem:[%s967_s0] sm:$0xf]  ;;  %s482_s26 = sshll.u32 %s216_s23, 4  ;;  %s483_s26 = int_to_ptr.vmem [resolvable:$true] %s482_s26 }
  0x16   : > { %s879_s30 = scalar_lea.vmem %s968_s1, %s593_s27  ;;  %460 = vperm.xlu0 %715, %v458_v36   ;;  %s484_s27 = sshll.u32 %s480_s21, 4  ;;  %s485_s27 = int_to_ptr.hbm [resolvable:$true] %s484_s27 }
  0x17   : > { %v255_v0 = vld [vmem:[%s879_s30 + $0x38] sm:$0xff]   ;;  %v253_v4 = vld [vmem:[%s879_s30 + $0x30] sm:$0xff]   ;;  %v251_v13 = vld [vmem:[%s879_s30 + $0x28] sm:$0xff]   ;;  %s732_s28 = sshra.s32 %s485_s27, 4  ;;  %s733_s28 = int_to_ptr.hbm [resolvable:$true] %s732_s28 }
  0x18   : > { %v657_v1 = vld [vmem:[%s879_s30 + $0x38] sm:$0xff]  ;;  %v352_v2 = vunpack.c.h.bf16 %v255_v0  ;;  %v351_v3 = vunpack.c.l.bf16 %v255_v0  ;;  %v656_v7 = vld [vmem:[%s879_s30 + $0x30] sm:$0xff]  ;;  %v350_v9 = vunpack.c.h.bf16 %v253_v4  ;;  %v349_v12 = vunpack.c.l.bf16 %v253_v4  ;;  %v655_v14 = vld [vmem:[%s879_s30 + $0x28] sm:$0xff]  ;;  %s734_s29 = scalar_lea.hbm %s733_s28, 8  ;;  %p739_p1 = scmp.lt.s32.totalorder %s733_s28, %s970_s3 }
  0x19   : > { %v322_v5 = vsel %vm296_vm0, %v657_v1, 0  ;;  %v319_v10 = vsel %vm296_vm0, %v656_v7, 0  ;;  %v348_v16 = vunpack.c.h.bf16 %v251_v13  ;;  %v316_v17 = vsel %vm296_vm0, %v655_v14, 0  ;;  %v249_v20 = vld [vmem:[%s879_s30 + $0x20] sm:$0xff]   ;;  %v247_v27 = vld [vmem:[%s879_s30 + $0x18] sm:$0xff]   ;;  %v245_v34 = vld [vmem:[%s879_s30 + $0x10] sm:$0xff]   ;;  %p735_p12 = scmp.ne.s32.totalorder %s733_s28, %s734_s29  ;;  %p740_p2 = scmp.lt.s32.totalorder %s738_s5, %s734_s29 }
  0x1a   : > { %v368_v6 = vmul.f32 %v352_v2, %v352_v2  ;;  %324 = vmatpush.bf16.xpose.msra.mxu0 %v322_v5  ;;  %v367_v8 = vmul.f32 %v351_v3, %v351_v3  ;;  %v366_v11 = vmul.f32 %v350_v9, %v350_v9  ;;  %v365_v15 = vmul.f32 %v349_v12, %v349_v12  ;;  %v654_v21 = vld [vmem:[%s879_s30 + $0x20] sm:$0xff]  ;;  %v653_v28 = vld [vmem:[%s879_s30 + $0x18] sm:$0xff]  ;;  %v652_v35 = vld [vmem:[%s879_s30 + $0x10] sm:$0xff] }
  0x1b   : > { %v364_v18 = vmul.f32 %v348_v16, %v348_v16  ;;  %v347_v19 = vunpack.c.l.bf16 %v251_v13  ;;  %v346_v23 = vunpack.c.h.bf16 %v249_v20  ;;  %v313_v24 = vsel %vm296_vm0, %v654_v21, 0  ;;  %v243_v43 = vld [vmem:[%s879_s30 + $0x8] sm:$0xff]   ;;  %v241_v50 = vld [vmem:[%s879_s30] sm:$0xff]   ;;  %p736_p13 = pnand %p735_p12, %p860_p4  ;;  %p741_p3 = por %p740_p2, %p739_p1 }
  0x1c   : > { %627 = vmatpush.xpose.msk.msra.mxu1 %vm296_vm0, %v368_v6  ;;  %v345_v26 = vunpack.c.l.bf16 %v249_v20  ;;  %v344_v30 = vunpack.c.h.bf16 %v247_v27  ;;  %v310_v31 = vsel %vm296_vm0, %v653_v28, 0  ;;  %v343_v33 = vunpack.c.l.bf16 %v247_v27  ;;  %v651_v44 = vld [vmem:[%s879_s30 + $0x8] sm:$0xff]  ;;  %v650_v51 = vld [vmem:[%s879_s30] sm:$0xff] }
  0x1d   : > { %v363_v22 = vmul.f32 %v347_v19, %v347_v19  ;;  %v362_v25 = vmul.f32 %v346_v23, %v346_v23  ;;  %v342_v38 = vunpack.c.h.bf16 %v245_v34  ;;  %v307_v40 = vsel %vm296_vm0, %v652_v35, 0  ;;  %p737_p0 = pneg %p736_p13 }
  0x1e   : > { %v361_v29 = vmul.f32 %v345_v26, %v345_v26  ;;  %v360_v32 = vmul.f32 %v344_v30, %v344_v30  ;;  %v359_v37 = vmul.f32 %v343_v33, %v343_v33  ;;  %v341_v42 = vunpack.c.l.bf16 %v245_v34 }
  0x1f   : > { %v358_v41 = vmul.f32 %v342_v38, %v342_v38  ;;  %v340_v46 = vunpack.c.h.bf16 %v243_v43  ;;  %v304_v47 = vsel %vm296_vm0, %v651_v44, 0  ;;  %v339_v49 = vunpack.c.l.bf16 %v243_v43  ;;  %p742_p5 = pnand %p741_p3, %p737_p0 }
  0x20   : > { %628 = vmatpush.xpose.msk.msra.mxu1 %vm296_vm0, %v367_v8  ;;  %v357_v45 = vmul.f32 %v341_v42, %v341_v42  ;;  %v338_v53 = vunpack.c.h.bf16 %v241_v50  ;;  %v301_v54 = vsel %vm296_vm0, %v650_v51, 0  ;;  %v337_v56 = vunpack.c.l.bf16 %v241_v50 }
  0x21   : > { %v356_v48 = vmul.f32 %v340_v46, %v340_v46  ;;  %v355_v52 = vmul.f32 %v339_v49, %v339_v49  ;;  %v454_v3 = vlaneseq  ;;  %v456_v7 = vstv %s644_s8 }
  0x22   : > { %325 = vmatpush.bf16.xpose.msra.mxu0 %v319_v10  ;;  %v354_v55 = vmul.f32 %v338_v53, %v338_v53  ;;  %v353_v57 = vmul.f32 %v337_v56, %v337_v56 }
  0x23   : > { %v455_v6 = vand.u32 127, %v454_v3 }
  0x24   : > { %629 = vmatpush.xpose.msk.msra.mxu1 %vm296_vm0, %v366_v11 }
  0x25   : > { %v457_v10 = vadd.s32 %v456_v7, %v455_v6 }
  0x28   : > { %630 = vmatpush.xpose.msk.msra.mxu1 %vm296_vm0, %v365_v15 }
  0x2a   : > { %326 = vmatpush.bf16.xpose.msra.mxu0 %v316_v17 }
  0x2c   : > { %631 = vmatpush.xpose.msk.msra.mxu1 %vm296_vm0, %v364_v18 }
  0x30   : > { %632 = vmatpush.xpose.msk.msra.mxu1 %vm296_vm0, %v363_v22 }
  0x32   : > { %327 = vmatpush.bf16.xpose.msra.mxu0 %v313_v24 }
  0x34   : > { %633 = vmatpush.xpose.msk.msra.mxu1 %vm296_vm0, %v362_v25 }
  0x38   : > { %634 = vmatpush.xpose.msk.msra.mxu1 %vm296_vm0, %v361_v29 }
  0x3a   : > { %328 = vmatpush.bf16.xpose.msra.mxu0 %v310_v31 }
  0x3c   : > { %635 = vmatpush.xpose.msk.msra.mxu1 %vm296_vm0, %v360_v32 }
  0x40   : > { %636 = vmatpush.xpose.msk.msra.mxu1 %vm296_vm0, %v359_v37 }
  0x42   : > { %329 = vmatpush.bf16.xpose.msra.mxu0 %v307_v40 }
  0x44   : > { %637 = vmatpush.xpose.msk.msra.mxu1 %vm296_vm0, %v358_v41 }
  0x48   : > { %638 = vmatpush.xpose.msk.msra.mxu1 %vm296_vm0, %v357_v45 }
  0x4a   : > { %330 = vmatpush.bf16.xpose.msra.mxu0 %v304_v47 }
  0x4c   : > { %639 = vmatpush.xpose.msk.msra.mxu1 %vm296_vm0, %v356_v48 }
  0x50   : > { %640 = vmatpush.xpose.msk.msra.mxu1 %vm296_vm0, %v355_v52 }
  0x52   : > { %331 = vmatpush.bf16.xpose.msra.mxu0 %v301_v54 }
  0x54   : > { %641 = vmatpush.xpose.msk.msra.mxu1 %vm296_vm0, %v354_v55 }
  0x58   : > { %642 = vmatpush.xpose.msk.msra.mxu1 %vm296_vm0, %v353_v57 }
  0x59   : > { %626 = vmatmul.msk.bf16.vlgmr.msra.gmra.mxu0 %vm296_vm0, %v239_v58 }
  0x5b   : > { %643 = vmatmul.msk.f32.vlgmr.msra.gmra.mxu1 %vm296_vm0, %v799_v59 }
  0x88   : > { %v461_v12 = vpop.permute.xlu0 %460 }
  0x89   : > { %vm462_vm4 = vcmp.eq.s32.totalorder %v457_v10, %v461_v12 }
  0xd6   : > { %v333_v60 = vpop.f32.mrf.mxu0 }
  0xd8   : > { %v437_v61 = vpop.f32.mrf.mxu1 }
  0xd9   : > { %v440_v62 = vmax.f32 %v437_v61, 1e-24 }
  0xdb   : > { %716 = vrsqrt.f32 %v440_v62  ;;  %vm447_vm2 = vweird.f32 %v440_v62 }
  0xde   : > { %v335_v63 = vpop.f32.mrf.mxu0 }
  0xe1   : > { %v717_v0 = vpop.eup %716 }
  0xe2   : > { %v442_v1 = vmul.f32 %v717_v0, %v440_v62  ;;  %vm448_vm1 = vweird.f32 %v717_v0 }
  0xe3   : > { %vm449_vm3 = vmor %vm447_vm2, %vm448_vm1 }
  0xe4   : > { %v443_v2 = vmul.f32 %v717_v0, %v442_v1 }
  0xe6   : > { %v444_v4 = vmul.f32 0.5, %v443_v2 }
  0xe8   : > { %v445_v5 = vsub.f32 1.5, %v444_v4 }
  0xea   : > { %v446_v8 = vmul.f32 %v717_v0, %v445_v5 }
  0xec   : > { %v450_v9 = vsel %vm449_vm3, %v717_v0, %v446_v8 }
  0xed   : > { %v451_v11 = vperm.slane %v450_v9, 0 }
  0xef   : > { %v452_v13 = vmul.f32 %v451_v11, %v333_v60 }
  0xf1   : > { %v645_v14 = vadd.f32 -0.35, %v452_v13 }
  0xf3   : > { %v464_v15 = vsel %vm462_vm4, %v645_v14, %v452_v13 }
  0xf4   : > { %v465_v16 = vmul.f32 64.0, %v464_v15 }
  0xf6   : > { %466 = vst [vmem:[%s216_s23] sm:$0xff] %v465_v16 }
  0xf7   : > { %745 = shalt.err (!%p742_p5)
}
  0xf8   : > { %658 = dma.vmem_to_hbm [thread:$0]  (%p860_p4), %s483_s26, 128, %s485_s27, %s468_s15  }
  0xf9 PF: > { %p664_p6 = scmp.ge.s32.totalorder %s796_s17, 2  ;;  %s496_s8 = sand.u32 1, %s776_s12  }
  0xfa   : > { %s497_s9 = scalar_lea.sflag [#allocation3], %s496_s8 }
  0xfb   : > { %p661_p7 = pnand %p664_p6, %p867_p8 }
  0xfd   : > { %p662_p9 = pneg %p661_p7 }
  0xff   : > { %771 = dma.done.wait (%p662_p9), %s497_s9, 128  }
 0x100   : > { %773 = vsyncadd (%p662_p9), %s497_s9, 4294967168  ;;  %s16_s17 = sadd.s32 1, %s796_s17   ;;  %s973_s12 = smov %s780_s13 }
 0x101   : > { %p13_p10 = scmp.ge.s32.totalorder %s16_s17, 4   ;;  %s974_s13 = smov %s784_s14 }
 0x102   : > { %s975_s14 = smov %s873_s25  ;;  %s976_s15 = smov %s792_s16 }
 0x103   : > { %s977_s16 = smov %s979_s20  ;;  %15 = sbr.rel (!%p13_p10) target bundleno = 4 (0x4), region = 73 }
 0x108   :  { %503 = vsyncpa [#allocation3], 1 }
 0x109   :  { %505 = vsyncpa [#allocation3 + $0x1], 1 }

</bundles_post_ra>
